<compile_context>
chip_gen: v7x
topology: tpu7x:2x2x1
jax: 0.10.0
libtpu: 0.0.40
codegen_flags: <defaults>
</compile_context>

<pallas_src>
import jax
import jax.numpy as jnp
from jax.experimental import pallas as pl
from jax.experimental.pallas import tpu as pltpu

IN_DIM = 28 * 28       # 784  (logical feature dim, as in PyTorch)
IN_PAD = 896           # 7 * 128 : lane-dense padded feature dim
H1 = 128
LATENT = 32            # logical latent dim
LAT_PAD = 128          # lane-dense padded latent dim
MAX_B_TILE = 512       # rows per grid step (upper bound)


def _ae_kernel(x_ref,
               w1_ref, b1_ref,
               w2_ref, b2_ref,
               w3_ref, b3_ref,
               w4_ref, b4_ref,
               o_ref):
    """Entire (padded) autoencoder MLP for one batch tile.

    x_ref : (b_tile, IN_PAD)  zero-padded flattened input
    wN/bN : padded weight (in, out) and bias (1, out), resident in VMEM
    o_ref : (b_tile, IN_PAD)  sigmoid output (padded cols sliced off outside)
    """
    x = x_ref[...]

    # Encoder
    h1 = jnp.dot(x, w1_ref[...], preferred_element_type=jnp.float32) + b1_ref[...]
    h1 = jnp.maximum(h1, 0.0)                                   # ReLU
    z = jnp.dot(h1, w2_ref[...], preferred_element_type=jnp.float32) + b2_ref[...]
    z = jnp.maximum(z, 0.0)                                     # ReLU

    # Decoder
    d1 = jnp.dot(z, w3_ref[...], preferred_element_type=jnp.float32) + b3_ref[...]
    d1 = jnp.maximum(d1, 0.0)                                   # ReLU
    logits = jnp.dot(d1, w4_ref[...], preferred_element_type=jnp.float32) + b4_ref[...]

    o_ref[...] = jax.nn.sigmoid(logits)                         # Sigmoid (EUP)


def _choose_b_tile(B):
    """Largest tile <= MAX_B_TILE that still leaves >=2 grid steps when the
    batch allows it (helps v7x's 2 TensorCores); tiny batches get one small
    sublane-aligned tile with minimal padding."""
    for bt in (512, 256, 128, 64, 32, 16, 8):
        if bt <= MAX_B_TILE and B >= 2 * bt:
            return bt
    return 8


def _pad_params(params):
    """Zero-pad weights/biases to lane-dense shapes (bit-identical math)."""
    w1, b1, w2, b2, w3, b3, w4, b4 = params

    def pad2(a, rows, cols):
        return jnp.pad(a, ((0, rows - a.shape[0]), (0, cols - a.shape[1])))

    return (pad2(w1, IN_PAD, H1),  pad2(b1, 1, H1),        # (896,128), (1,128)
            pad2(w2, H1, LAT_PAD), pad2(b2, 1, LAT_PAD),   # (128,128), (1,128)
            pad2(w3, LAT_PAD, H1), pad2(b3, 1, H1),        # (128,128), (1,128)
            pad2(w4, H1, IN_PAD),  pad2(b4, 1, IN_PAD))    # (128,896), (1,896)


@jax.jit
def autoencoder_forward(x_nchw, params):
    """x_nchw: (B, 1, 28, 28) float32  ->  (B, 1, 28, 28) float32."""
    B = x_nchw.shape[0]
    b_tile = _choose_b_tile(B)
    b_pad = pl.cdiv(B, b_tile) * b_tile

    # nn.Flatten (row-major, same as torch), then zero-pad batch & features.
    x2d = x_nchw.reshape(B, IN_DIM)
    x2d = jnp.pad(x2d, ((0, b_pad - B), (0, IN_PAD - IN_DIM)))

    (w1, b1, w2, b2, w3, b3, w4, b4) = _pad_params(params)

    # Whole (small) weight/bias arrays as single resident blocks.
    full = lambda shape: pl.BlockSpec(shape, lambda i: (0, 0))

    # Advisory cost estimate (padded dims).
    flops = 2 * b_pad * (IN_PAD * H1 + H1 * LAT_PAD + LAT_PAD * H1 + H1 * IN_PAD)
    transcendentals = b_pad * IN_PAD
    weight_bytes = 4 * (IN_PAD * H1 + H1 + H1 * LAT_PAD + LAT_PAD
                        + LAT_PAD * H1 + H1 + H1 * IN_PAD + IN_PAD)
    bytes_accessed = 4 * b_pad * IN_PAD * 2 + weight_bytes
    cost = pl.CostEstimate(flops=flops,
                           transcendentals=transcendentals,
                           bytes_accessed=bytes_accessed)

    out2d = pl.pallas_call(
        _ae_kernel,
        out_shape=jax.ShapeDtypeStruct((b_pad, IN_PAD), jnp.float32),
        grid_spec=pltpu.PrefetchScalarGridSpec(
            num_scalar_prefetch=0,
            grid=(b_pad // b_tile,),
            in_specs=[
                pl.BlockSpec((b_tile, IN_PAD), lambda i: (i, 0)),   # x tile
                full(w1.shape), full(b1.shape),
                full(w2.shape), full(b2.shape),
                full(w3.shape), full(b3.shape),
                full(w4.shape), full(b4.shape),
            ],
            out_specs=pl.BlockSpec((b_tile, IN_PAD), lambda i: (i, 0)),
        ),
        compiler_params=pltpu.CompilerParams(
            dimension_semantics=("parallel",),
            # Headroom above v5e's 16 MiB scoped default; well under v7x's
            # 64 MiB physical VMEM even with 512-row double-buffered tiles.
            vmem_limit_bytes=48 * 1024 * 1024,
        ),
        cost_estimate=cost,
    )(x2d, w1, b1, w2, b2, w3, b3, w4, b4)

    # Drop batch/feature padding, then nn.Unflatten(1, (1, 28, 28)).
    return out2d[:B, :IN_DIM].reshape(B, 1, 28, 28)


def init_params(key):
    """Deterministic init matching nn.Linear shapes.

    PyTorch nn.Linear(in, out) has W:(out, in), b:(out,), init U(-k, k),
    k = 1/sqrt(in).  We store W transposed as (in, out) and b as (1, out);
    padding to lane-dense shapes happens inside the forward wrapper.
    """
    def linear(key, in_f, out_f):
        kw, kb = jax.random.split(key)
        k = 1.0 / jnp.sqrt(jnp.float32(in_f))
        w = jax.random.uniform(kw, (in_f, out_f), jnp.float32, -k, k)
        b = jax.random.uniform(kb, (1, out_f), jnp.float32, -k, k)
        return w, b

    k1, k2, k3, k4 = jax.random.split(key, 4)
    w1, b1 = linear(k1, IN_DIM, H1)     # Encoder Linear(784, 128)
    w2, b2 = linear(k2, H1, LATENT)     # Encoder Linear(128, 32)
    w3, b3 = linear(k3, LATENT, H1)     # Decoder Linear(32, 128)
    w4, b4 = linear(k4, H1, IN_DIM)     # Decoder Linear(128, 784)
    return (w1, b1, w2, b2, w3, b3, w4, b4)


def _reference_forward(x_nchw, params):
    """Pure-JAX reference (unpadded) for a correctness sanity check."""
    (w1, b1, w2, b2, w3, b3, w4, b4) = params
    x = x_nchw.reshape(x_nchw.shape[0], IN_DIM)
    h = jax.nn.relu(x @ w1 + b1)
    z = jax.nn.relu(h @ w2 + b2)
    d = jax.nn.relu(z @ w3 + b3)
    y = jax.nn.sigmoid(d @ w4 + b4)
    return y.reshape(-1, 1, 28, 28)


if __name__ == "__main__":
    key = jax.random.PRNGKey(0)
    k_params, k_x = jax.random.split(key)

    params = init_params(k_params)
    x = jax.random.uniform(k_x, (8, 1, 28, 28), jnp.float32)   # small MNIST-like batch

    out = autoencoder_forward(x, params)
    out = jax.block_until_ready(out)

    ref = _reference_forward(x, params)
    assert out.shape == (8, 1, 28, 28)
    assert jnp.allclose(out, ref, atol=1e-5, rtol=1e-5)

    print("KERNEL_OK")
</pallas_src>

<mosaic_0001>
module attributes {stable_mosaic.version = 11 : i64} {
  func.func @_ae_kernel(%arg0: i32, %arg1: memref<8x896xf32, #tpu.memory_space<vmem>>, %arg2: memref<896x128xf32, #tpu.memory_space<vmem>>, %arg3: memref<1x128xf32, #tpu.memory_space<vmem>>, %arg4: memref<128x128xf32, #tpu.memory_space<vmem>>, %arg5: memref<1x128xf32, #tpu.memory_space<vmem>>, %arg6: memref<128x128xf32, #tpu.memory_space<vmem>>, %arg7: memref<1x128xf32, #tpu.memory_space<vmem>>, %arg8: memref<128x896xf32, #tpu.memory_space<vmem>>, %arg9: memref<1x896xf32, #tpu.memory_space<vmem>>, %arg10: memref<8x896xf32, #tpu.memory_space<vmem>>) attributes {dimension_semantics = [#tpu.dimension_semantics<parallel>], iteration_bounds = array<i64: 1>, scalar_prefetch = 0 : i64, scratch_operands = 0 : i64, tpu.core_type = #tpu.core_type<tc>, window_params = [{transform_indices = @transform_0, window_bounds = array<i64: 8, 896>}, {pipeline_mode = #tpu.pipeline_mode<synchronous>, transform_indices = @transform_1, window_bounds = array<i64: 896, 128>}, {pipeline_mode = #tpu.pipeline_mode<synchronous>, transform_indices = @transform_2, window_bounds = array<i64: 1, 128>}, {pipeline_mode = #tpu.pipeline_mode<synchronous>, transform_indices = @transform_3, window_bounds = array<i64: 128, 128>}, {pipeline_mode = #tpu.pipeline_mode<synchronous>, transform_indices = @transform_4, window_bounds = array<i64: 1, 128>}, {pipeline_mode = #tpu.pipeline_mode<synchronous>, transform_indices = @transform_5, window_bounds = array<i64: 128, 128>}, {pipeline_mode = #tpu.pipeline_mode<synchronous>, transform_indices = @transform_6, window_bounds = array<i64: 1, 128>}, {pipeline_mode = #tpu.pipeline_mode<synchronous>, transform_indices = @transform_7, window_bounds = array<i64: 128, 896>}, {pipeline_mode = #tpu.pipeline_mode<synchronous>, transform_indices = @transform_8, window_bounds = array<i64: 1, 896>}, {transform_indices = @transform_9, window_bounds = array<i64: 8, 896>}]} {
    %c0 = arith.constant 0 : index
    %c0_0 = arith.constant 0 : index
    %0 = vector.load %arg1[%c0, %c0_0] : memref<8x896xf32, #tpu.memory_space<vmem>>, vector<8x896xf32>
    %c0_1 = arith.constant 0 : index
    %c0_2 = arith.constant 0 : index
    %1 = vector.load %arg2[%c0_1, %c0_2] : memref<896x128xf32, #tpu.memory_space<vmem>>, vector<896x128xf32>
    %cst = arith.constant dense<0.000000e+00> : vector<8x128xf32>
    %2 = tpu.matmul %0, %1, %cst {dimension_numbers = #tpu.dot_dimension_numbers<[1], [0], [0], [1], [0, 0, 1, 1], [], []>} : vector<8x896xf32>, vector<896x128xf32>, vector<8x128xf32> -> vector<8x128xf32>
    %c0_3 = arith.constant 0 : index
    %c0_4 = arith.constant 0 : index
    %3 = vector.load %arg3[%c0_3, %c0_4] : memref<1x128xf32, #tpu.memory_space<vmem>>, vector<1x128xf32>
    %4 = vector.broadcast %3 : vector<1x128xf32> to vector<8x128xf32>
    %5 = arith.addf %2, %4 : vector<8x128xf32>
    %cst_5 = arith.constant 0.000000e+00 : f32
    %6 = vector.broadcast %cst_5 : f32 to vector<8x128xf32>
    %7 = arith.maximumf %5, %6 : vector<8x128xf32>
    %c0_6 = arith.constant 0 : index
    %c0_7 = arith.constant 0 : index
    %8 = vector.load %arg4[%c0_6, %c0_7] : memref<128x128xf32, #tpu.memory_space<vmem>>, vector<128x128xf32>
    %cst_8 = arith.constant dense<0.000000e+00> : vector<8x128xf32>
    %9 = tpu.matmul %7, %8, %cst_8 {dimension_numbers = #tpu.dot_dimension_numbers<[1], [0], [0], [1], [0, 0, 1, 1], [], []>} : vector<8x128xf32>, vector<128x128xf32>, vector<8x128xf32> -> vector<8x128xf32>
    %c0_9 = arith.constant 0 : index
    %c0_10 = arith.constant 0 : index
    %10 = vector.load %arg5[%c0_9, %c0_10] : memref<1x128xf32, #tpu.memory_space<vmem>>, vector<1x128xf32>
    %11 = vector.broadcast %10 : vector<1x128xf32> to vector<8x128xf32>
    %12 = arith.addf %9, %11 : vector<8x128xf32>
    %cst_11 = arith.constant 0.000000e+00 : f32
    %13 = vector.broadcast %cst_11 : f32 to vector<8x128xf32>
    %14 = arith.maximumf %12, %13 : vector<8x128xf32>
    %c0_12 = arith.constant 0 : index
    %c0_13 = arith.constant 0 : index
    %15 = vector.load %arg6[%c0_12, %c0_13] : memref<128x128xf32, #tpu.memory_space<vmem>>, vector<128x128xf32>
    %cst_14 = arith.constant dense<0.000000e+00> : vector<8x128xf32>
    %16 = tpu.matmul %14, %15, %cst_14 {dimension_numbers = #tpu.dot_dimension_numbers<[1], [0], [0], [1], [0, 0, 1, 1], [], []>} : vector<8x128xf32>, vector<128x128xf32>, vector<8x128xf32> -> vector<8x128xf32>
    %c0_15 = arith.constant 0 : index
    %c0_16 = arith.constant 0 : index
    %17 = vector.load %arg7[%c0_15, %c0_16] : memref<1x128xf32, #tpu.memory_space<vmem>>, vector<1x128xf32>
    %18 = vector.broadcast %17 : vector<1x128xf32> to vector<8x128xf32>
    %19 = arith.addf %16, %18 : vector<8x128xf32>
    %cst_17 = arith.constant 0.000000e+00 : f32
    %20 = vector.broadcast %cst_17 : f32 to vector<8x128xf32>
    %21 = arith.maximumf %19, %20 : vector<8x128xf32>
    %c0_18 = arith.constant 0 : index
    %c0_19 = arith.constant 0 : index
    %22 = vector.load %arg8[%c0_18, %c0_19] : memref<128x896xf32, #tpu.memory_space<vmem>>, vector<128x896xf32>
    %cst_20 = arith.constant dense<0.000000e+00> : vector<8x896xf32>
    %23 = tpu.matmul %21, %22, %cst_20 {dimension_numbers = #tpu.dot_dimension_numbers<[1], [0], [0], [1], [0, 0, 1, 1], [], []>} : vector<8x128xf32>, vector<128x896xf32>, vector<8x896xf32> -> vector<8x896xf32>
    %c0_21 = arith.constant 0 : index
    %c0_22 = arith.constant 0 : index
    %24 = vector.load %arg9[%c0_21, %c0_22] : memref<1x896xf32, #tpu.memory_space<vmem>>, vector<1x896xf32>
    %25 = vector.broadcast %24 : vector<1x896xf32> to vector<8x896xf32>
    %26 = arith.addf %23, %25 : vector<8x896xf32>
    %27 = arith.negf %26 : vector<8x896xf32>
    %28 = math.exp %27 : vector<8x896xf32>
    %cst_23 = arith.constant 1.000000e+00 : f32
    %29 = vector.broadcast %cst_23 : f32 to vector<8x896xf32>
    %30 = arith.addf %29, %28 : vector<8x896xf32>
    %31 = arith.divf %29, %30 : vector<8x896xf32>
    %c0_24 = arith.constant 0 : index
    %c0_25 = arith.constant 0 : index
    %32 = vector.load %arg10[%c0_24, %c0_25] : memref<8x896xf32, #tpu.memory_space<vmem>>, vector<8x896xf32>
    tpu.vector_store %arg10[%c0_24, %c0_25], %31 {strides = array<i32>} : memref<8x896xf32, #tpu.memory_space<vmem>>, vector<8x896xf32>,
    return
  }
  func.func @transform_0(%arg0: i32) -> (i32, i32) {
    %c0_i32 = arith.constant 0 : i32
    %c0_i32_0 = arith.constant 0 : i32
    return %arg0, %c0_i32 : i32, i32
  }
  func.func @transform_1(%arg0: i32) -> (i32, i32) {
    %c0_i32 = arith.constant 0 : i32
    %c0_i32_0 = arith.constant 0 : i32
    %c0_i32_1 = arith.constant 0 : i32
    return %c0_i32, %c0_i32_0 : i32, i32
  }
  func.func @transform_2(%arg0: i32) -> (i32, i32) {
    %c0_i32 = arith.constant 0 : i32
    %c0_i32_0 = arith.constant 0 : i32
    %c0_i32_1 = arith.constant 0 : i32
    return %c0_i32, %c0_i32_0 : i32, i32
  }
  func.func @transform_3(%arg0: i32) -> (i32, i32) {
    %c0_i32 = arith.constant 0 : i32
    %c0_i32_0 = arith.constant 0 : i32
    %c0_i32_1 = arith.constant 0 : i32
    return %c0_i32, %c0_i32_0 : i32, i32
  }
  func.func @transform_4(%arg0: i32) -> (i32, i32) {
    %c0_i32 = arith.constant 0 : i32
    %c0_i32_0 = arith.constant 0 : i32
    %c0_i32_1 = arith.constant 0 : i32
    return %c0_i32, %c0_i32_0 : i32, i32
  }
  func.func @transform_5(%arg0: i32) -> (i32, i32) {
    %c0_i32 = arith.constant 0 : i32
    %c0_i32_0 = arith.constant 0 : i32
    %c0_i32_1 = arith.constant 0 : i32
    return %c0_i32, %c0_i32_0 : i32, i32
  }
  func.func @transform_6(%arg0: i32) -> (i32, i32) {
    %c0_i32 = arith.constant 0 : i32
    %c0_i32_0 = arith.constant 0 : i32
    %c0_i32_1 = arith.constant 0 : i32
    return %c0_i32, %c0_i32_0 : i32, i32
  }
  func.func @transform_7(%arg0: i32) -> (i32, i32) {
    %c0_i32 = arith.constant 0 : i32
    %c0_i32_0 = arith.constant 0 : i32
    %c0_i32_1 = arith.constant 0 : i32
    return %c0_i32, %c0_i32_0 : i32, i32
  }
  func.func @transform_8(%arg0: i32) -> (i32, i32) {
    %c0_i32 = arith.constant 0 : i32
    %c0_i32_0 = arith.constant 0 : i32
    %c0_i32_1 = arith.constant 0 : i32
    return %c0_i32, %c0_i32_0 : i32, i32
  }
  func.func @transform_9(%arg0: i32) -> (i32, i32) {
    %c0_i32 = arith.constant 0 : i32
    %c0_i32_0 = arith.constant 0 : i32
    return %arg0, %c0_i32 : i32, i32
  }
}

</mosaic_0001>

<bundles_post_ra>
// kernel: autoencoder_forward.1
= control target key start
LH: loop header
LB: loop body
LE: loop exit
PB: predicated region body
PF: predicated region fallthrough
CT: control target
= control target key end

     0   :  { %vm1755_vm0 = vmmov 0   ;;  %s2678_s1 = inlined_call_operand.vmem [shape: f32[896,128], index: 1, kind: input, shape index: {}]   ;;  %s2679_s0 = inlined_call_operand.vmem [shape: f32[8,896], index: 0, kind: input, shape index: {}]   ;;  %s2680_s3 = inlined_call_operand.vmem [shape: f32[128,128], index: 3, kind: input, shape index: {}]   ;;  %s2681_s5 = inlined_call_operand.vmem [shape: f32[128,128], index: 5, kind: input, shape index: {}]   ;;  %s2682_s2 = inlined_call_operand.vmem [shape: f32[1,128], index: 2, kind: input, shape index: {}]   ;;  %s2683_s7 = inlined_call_operand.vmem [shape: f32[128,896], index: 7, kind: input, shape index: {}]   ;;  %s2684_s4 = inlined_call_operand.vmem [shape: f32[1,128], index: 4, kind: input, shape index: {}]   ;;  %s2685_s6 = inlined_call_operand.vmem [shape: f32[1,128], index: 6, kind: input, shape index: {}]   ;;  %s2686_s8 = inlined_call_operand.vmem [shape: f32[1,896], index: 8, kind: input, shape index: {}]   ;;  %s2687_s9 = inlined_call_operand.vmem [shape: f32[8,896], index: 9, kind: output, shape index: {}]  }
   0x1   :  { %v55_v0 = vld [vmem:[%s2678_s1 + $0x80] sm:$0xff]  ;;  %v56_v1 = vld [vmem:[%s2678_s1 + $0x88] sm:$0xff]  ;;  %v57_v11 = vld [vmem:[%s2678_s1 + $0x90] sm:$0xff] }
   0x2   :  { %v39_v2 = vld [vmem:[%s2678_s1] sm:$0xff]  ;;  %v1435_v3 = vpack.c.bf16 %v56_v1, %v55_v0  ;;  %v40_v4 = vld [vmem:[%s2678_s1 + $0x8] sm:$0xff]  ;;  %v58_v13 = vld [vmem:[%s2678_s1 + $0x98] sm:$0xff] }
   0x3   :  { %v87_v5 = vld [vmem:[%s2678_s1 + $0x180] sm:$0xff]  ;;  %v88_v6 = vld [vmem:[%s2678_s1 + $0x188] sm:$0xff]  ;;  %v1437_v7 = vpack.c.bf16 %v40_v4, %v39_v2  ;;  %v41_v14 = vld [vmem:[%s2678_s1 + $0x10] sm:$0xff]  ;;  %v1439_v16 = vpack.c.bf16 %v58_v13, %v57_v11 }
   0x4   :  { %v1467_v8 = vpack.c.bf16 %v88_v6, %v87_v5  ;;  %v71_v9 = vld [vmem:[%s2678_s1 + $0x100] sm:$0xff]  ;;  %v72_v10 = vld [vmem:[%s2678_s1 + $0x108] sm:$0xff]  ;;  %1436 = vmatprep.subr.bf16.mxu0 %v1435_v3  ;;  %v42_v15 = vld [vmem:[%s2678_s1 + $0x18] sm:$0xff] }
   0x5   :  { %v1469_v12 = vpack.c.bf16 %v72_v10, %v71_v9  ;;  %1438 = vmatpush3.bf16.msra.mxu0 %v1437_v7  ;;  %v1441_v17 = vpack.c.bf16 %v42_v15, %v41_v14  ;;  %v89_v18 = vld [vmem:[%s2678_s1 + $0x190] sm:$0xff]  ;;  %v90_v19 = vld [vmem:[%s2678_s1 + $0x198] sm:$0xff]  ;;  %v59_v23 = vld [vmem:[%s2678_s1 + $0xa0] sm:$0xff] }
   0x6   :  { %1468 = vmatprep.subr.bf16.mxu1 %v1467_v8  ;;  %v73_v20 = vld [vmem:[%s2678_s1 + $0x110] sm:$0xff]  ;;  %v1471_v21 = vpack.c.bf16 %v90_v19, %v89_v18  ;;  %v74_v22 = vld [vmem:[%s2678_s1 + $0x118] sm:$0xff]  ;;  %v60_v24 = vld [vmem:[%s2678_s1 + $0xa8] sm:$0xff]  ;;  %1440 = vmatprep.subr.bf16.mxu0 %v1439_v16 }
   0x7   :  { %1470 = vmatpush3.bf16.msra.mxu1 %v1469_v12  ;;  %v1473_v25 = vpack.c.bf16 %v74_v22, %v73_v20  ;;  %v1443_v26 = vpack.c.bf16 %v60_v24, %v59_v23  ;;  %v43_v27 = vld [vmem:[%s2678_s1 + $0x20] sm:$0xff]  ;;  %v44_v28 = vld [vmem:[%s2678_s1 + $0x28] sm:$0xff]  ;;  %v61_v35 = vld [vmem:[%s2678_s1 + $0xb0] sm:$0xff] }
   0x8   :  { %v91_v29 = vld [vmem:[%s2678_s1 + $0x1a0] sm:$0xff]  ;;  %1472 = vmatprep.subr.bf16.mxu1 %v1471_v21  ;;  %v92_v30 = vld [vmem:[%s2678_s1 + $0x1a8] sm:$0xff]  ;;  %v1445_v33 = vpack.c.bf16 %v44_v28, %v43_v27  ;;  %v62_v36 = vld [vmem:[%s2678_s1 + $0xb8] sm:$0xff] }
   0x9   :  { %v75_v31 = vld [vmem:[%s2678_s1 + $0x120] sm:$0xff]  ;;  %v76_v32 = vld [vmem:[%s2678_s1 + $0x128] sm:$0xff]  ;;  %1442 = vmatpush3.bf16.msra.mxu0 %v1441_v17  ;;  %v1475_v34 = vpack.c.bf16 %v92_v30, %v91_v29  ;;  %v45_v37 = vld [vmem:[%s2678_s1 + $0x30] sm:$0xff]  ;;  %v1447_v39 = vpack.c.bf16 %v62_v36, %v61_v35 }
   0xa   :  { %1444 = vmatprep.subr.bf16.mxu0 %v1443_v26  ;;  %v1477_v38 = vpack.c.bf16 %v76_v32, %v75_v31  ;;  %v46_v40 = vld [vmem:[%s2678_s1 + $0x38] sm:$0xff]  ;;  %v93_v41 = vld [vmem:[%s2678_s1 + $0x1b0] sm:$0xff]  ;;  %v63_v46 = vld [vmem:[%s2678_s1 + $0xc0] sm:$0xff] }
   0xb   :  { %1474 = vmatpush3.bf16.msra.mxu1 %v1473_v25  ;;  %v94_v42 = vld [vmem:[%s2678_s1 + $0x1b8] sm:$0xff]  ;;  %v77_v44 = vld [vmem:[%s2678_s1 + $0x130] sm:$0xff]  ;;  %v64_v47 = vld [vmem:[%s2678_s1 + $0xc8] sm:$0xff]  ;;  %v1449_v48 = vpack.c.bf16 %v46_v40, %v45_v37 }
   0xc   :  { %1476 = vmatprep.subr.bf16.mxu1 %v1475_v34  ;;  %v1479_v43 = vpack.c.bf16 %v94_v42, %v93_v41  ;;  %v78_v45 = vld [vmem:[%s2678_s1 + $0x138] sm:$0xff]  ;;  %v95_v49 = vld [vmem:[%s2678_s1 + $0x1c0] sm:$0xff]  ;;  %v96_v50 = vld [vmem:[%s2678_s1 + $0x1c8] sm:$0xff]  ;;  %v1451_v52 = vpack.c.bf16 %v64_v47, %v63_v46 }
   0xd   :  { %1446 = vmatpush3.bf16.msra.mxu0 %v1445_v33  ;;  %v1481_v51 = vpack.c.bf16 %v78_v45, %v77_v44  ;;  %v47_v53 = vld [vmem:[%s2678_s1 + $0x40] sm:$0xff]  ;;  %v48_v54 = vld [vmem:[%s2678_s1 + $0x48] sm:$0xff]  ;;  %v1483_v56 = vpack.c.bf16 %v96_v50, %v95_v49  ;;  %v65_v58 = vld [vmem:[%s2678_s1 + $0xd0] sm:$0xff] }
   0xe   :  { %1448 = vmatprep.subr.bf16.mxu0 %v1447_v39  ;;  %v79_v55 = vld [vmem:[%s2678_s1 + $0x140] sm:$0xff]  ;;  %v80_v57 = vld [vmem:[%s2678_s1 + $0x148] sm:$0xff]  ;;  %v66_v59 = vld [vmem:[%s2678_s1 + $0xd8] sm:$0xff]  ;;  %v1453_v62 = vpack.c.bf16 %v48_v54, %v47_v53 }
   0xf   :  { %1478 = vmatpush3.bf16.msra.mxu1 %v1477_v38  ;;  %v97_v60 = vld [vmem:[%s2678_s1 + $0x1d0] sm:$0xff]  ;;  %v98_v61 = vld [vmem:[%s2678_s1 + $0x1d8] sm:$0xff]  ;;  %v1485_v63 = vpack.c.bf16 %v80_v57, %v79_v55  ;;  %v1455_v0 = vpack.c.bf16 %v66_v59, %v65_v58  ;;  %v67_v6 = vld [vmem:[%s2678_s1 + $0xe0] sm:$0xff] }
  0x10   :  { %1480 = vmatprep.subr.bf16.mxu1 %v1479_v43  ;;  %v49_v1 = vld [vmem:[%s2678_s1 + $0x50] sm:$0xff]  ;;  %v50_v2 = vld [vmem:[%s2678_s1 + $0x58] sm:$0xff]  ;;  %v1487_v4 = vpack.c.bf16 %v98_v61, %v97_v60  ;;  %v68_v7 = vld [vmem:[%s2678_s1 + $0xe8] sm:$0xff] }
  0x11   :  { %1450 = vmatpush3.bf16.msra.mxu0 %v1449_v48  ;;  %v81_v3 = vld [vmem:[%s2678_s1 + $0x150] sm:$0xff]  ;;  %v82_v5 = vld [vmem:[%s2678_s1 + $0x158] sm:$0xff]  ;;  %v99_v8 = vld [vmem:[%s2678_s1 + $0x1e0] sm:$0xff]  ;;  %v1457_v10 = vpack.c.bf16 %v50_v2, %v49_v1  ;;  %v1459_v14 = vpack.c.bf16 %v68_v7, %v67_v6  ;;  %v1756_v1 = vmov 0.0  }
  0x12   :  { %1452 = vmatprep.subr.bf16.mxu0 %v1451_v52  ;;  %v100_v9 = vld [vmem:[%s2678_s1 + $0x1e8] sm:$0xff]  ;;  %v51_v11 = vld [vmem:[%s2678_s1 + $0x60] sm:$0xff]  ;;  %v1489_v13 = vpack.c.bf16 %v82_v5, %v81_v3  ;;  %v69_v19 = vld [vmem:[%s2678_s1 + $0xf0] sm:$0xff] }
  0x13   :  { %1482 = vmatpush3.bf16.msra.mxu1 %v1481_v51  ;;  %v33_v12 = vld [vmem:[%s2679_s0 + $0x8] sm:$0xff]  ;;  %v83_v16 = vld [vmem:[%s2678_s1 + $0x160] sm:$0xff]  ;;  %v1491_v18 = vpack.c.bf16 %v100_v9, %v99_v8  ;;  %v70_v20 = vld [vmem:[%s2678_s1 + $0xf8] sm:$0xff]  ;;  %v1754_v51 = vmov 0.0|0.0  }
  0x14   :  { %1484 = vmatprep.subr.bf16.mxu1 %v1483_v56  ;;  %v52_v15 = vld [vmem:[%s2678_s1 + $0x68] sm:$0xff]  ;;  %222 = vmatprep.mubr.f32.mxu0 %v33_v12  ;;  %v35_v21 = vld [vmem:[%s2679_s0 + $0x18] sm:$0xff]  ;;  %v101_v22 = vld [vmem:[%s2678_s1 + $0x1f0] sm:$0xff]  ;;  %v1463_v26 = vpack.c.bf16 %v70_v20, %v69_v19 }
  0x15   :  { %1454 = vmatpush3.bf16.msra.mxu0 %v1453_v62  ;;  %v84_v17 = vld [vmem:[%s2678_s1 + $0x168] sm:$0xff]  ;;  %v102_v23 = vld [vmem:[%s2678_s1 + $0x1f8] sm:$0xff]  ;;  %292 = vmatprep.mubr.f32.mxu1 %v35_v21  ;;  %v1461_v24 = vpack.c.bf16 %v52_v15, %v51_v11  ;;  %v53_v27 = vld [vmem:[%s2678_s1 + $0x70] sm:$0xff] }
  0x16   :  { %1456 = vmatprep.subr.bf16.mxu0 %v1455_v0  ;;  %v1493_v25 = vpack.c.bf16 %v84_v17, %v83_v16  ;;  %v54_v28 = vld [vmem:[%s2678_s1 + $0x78] sm:$0xff]  ;;  %v85_v29 = vld [vmem:[%s2678_s1 + $0x170] sm:$0xff]  ;;  %v1495_v30 = vpack.c.bf16 %v102_v23, %v101_v22  ;;  %v119_v32 = vld [vmem:[%s2678_s1 + $0x280] sm:$0xff] }
  0x17   :  { %1486 = vmatpush3.bf16.msra.mxu1 %v1485_v63  ;;  %v86_v31 = vld [vmem:[%s2678_s1 + $0x178] sm:$0xff]  ;;  %v120_v33 = vld [vmem:[%s2678_s1 + $0x288] sm:$0xff]  ;;  %v1465_v34 = vpack.c.bf16 %v54_v28, %v53_v27  ;;  %v103_v37 = vld [vmem:[%s2678_s1 + $0x200] sm:$0xff] }
  0x18   :  { %1488 = vmatprep.subr.bf16.mxu1 %v1487_v4  ;;  %v1497_v35 = vpack.c.bf16 %v86_v31, %v85_v29  ;;  %v1499_v36 = vpack.c.bf16 %v120_v33, %v119_v32  ;;  %v104_v38 = vld [vmem:[%s2678_s1 + $0x208] sm:$0xff]  ;;  %v121_v39 = vld [vmem:[%s2678_s1 + $0x290] sm:$0xff]  ;;  %v122_v40 = vld [vmem:[%s2678_s1 + $0x298] sm:$0xff] }
  0x19   :  { %1458 = vmatpush3.bf16.msra.mxu0 %v1457_v10  ;;  %v135_v41 = vld [vmem:[%s2678_s1 + $0x300] sm:$0xff]  ;;  %v136_v42 = vld [vmem:[%s2678_s1 + $0x308] sm:$0xff]  ;;  %v1501_v44 = vpack.c.bf16 %v104_v38, %v103_v37  ;;  %v34_v45 = vld [vmem:[%s2679_s0 + $0x10] sm:$0xff]  ;;  %v1503_v46 = vpack.c.bf16 %v122_v40, %v121_v39 }
  0x1a   :  { %1460 = vmatprep.subr.bf16.mxu0 %v1459_v14  ;;  %v32_v43 = vld [vmem:[%s2679_s0] sm:$0xff]  ;;  %v105_v47 = vld [vmem:[%s2678_s1 + $0x210] sm:$0xff]  ;;  %v106_v48 = vld [vmem:[%s2678_s1 + $0x218] sm:$0xff]  ;;  %v1532_v49 = vpack.c.bf16 %v136_v42, %v135_v41 }
  0x1b   :  { %1490 = vmatpush3.bf16.msra.mxu1 %v1489_v13  ;;  %v123_v50 = vld [vmem:[%s2678_s1 + $0x2a0] sm:$0xff]  ;;  %v124_v52 = vld [vmem:[%s2678_s1 + $0x2a8] sm:$0xff]  ;;  %v137_v53 = vld [vmem:[%s2678_s1 + $0x310] sm:$0xff]  ;;  %v1505_v55 = vpack.c.bf16 %v106_v48, %v105_v47 }
  0x1c   :  { %1492 = vmatprep.subr.bf16.mxu1 %v1491_v18  ;;  %v138_v54 = vld [vmem:[%s2678_s1 + $0x318] sm:$0xff]  ;;  %v107_v56 = vld [vmem:[%s2678_s1 + $0x220] sm:$0xff]  ;;  %v1507_v57 = vpack.c.bf16 %v124_v52, %v123_v50  ;;  %v108_v58 = vld [vmem:[%s2678_s1 + $0x228] sm:$0xff] }
  0x1d   :  { %1462 = vmatpush3.bf16.msra.mxu0 %v1461_v24  ;;  %v1535_v59 = vpack.c.bf16 %v138_v54, %v137_v53  ;;  %v125_v60 = vld [vmem:[%s2678_s1 + $0x2b0] sm:$0xff]  ;;  %v126_v61 = vld [vmem:[%s2678_s1 + $0x2b8] sm:$0xff]  ;;  %v139_v62 = vld [vmem:[%s2678_s1 + $0x320] sm:$0xff]  ;;  %v1509_v2 = vpack.c.bf16 %v108_v58, %v107_v56 }
  0x1e   :  { %1464 = vmatprep.subr.bf16.mxu0 %v1463_v26  ;;  %v140_v63 = vld [vmem:[%s2678_s1 + $0x328] sm:$0xff]  ;;  %v1511_v3 = vpack.c.bf16 %v126_v61, %v125_v60  ;;  %v109_v4 = vld [vmem:[%s2678_s1 + $0x230] sm:$0xff]  ;;  %v110_v5 = vld [vmem:[%s2678_s1 + $0x238] sm:$0xff] }
  0x1f   :  { %1494 = vmatpush3.bf16.msra.mxu1 %v1493_v25  ;;  %v37_v0 = vld [vmem:[%s2679_s0 + $0x28] sm:$0xff]  ;;  %v1538_v6 = vpack.c.bf16 %v140_v63, %v139_v62  ;;  %v127_v7 = vld [vmem:[%s2678_s1 + $0x2c0] sm:$0xff]  ;;  %v141_v9 = vld [vmem:[%s2678_s1 + $0x330] sm:$0xff]  ;;  %v1513_v11 = vpack.c.bf16 %v110_v5, %v109_v4 }
  0x20   :  { %1496 = vmatprep.subr.bf16.mxu1 %v1495_v30  ;;  %v128_v8 = vld [vmem:[%s2678_s1 + $0x2c8] sm:$0xff]  ;;  %v142_v10 = vld [vmem:[%s2678_s1 + $0x338] sm:$0xff]  ;;  %v111_v13 = vld [vmem:[%s2678_s1 + $0x240] sm:$0xff] }
  0x21   :  { %1466 = vmatpush3.bf16.msra.mxu0 %v1465_v34  ;;  %v1515_v12 = vpack.c.bf16 %v128_v8, %v127_v7  ;;  %v112_v14 = vld [vmem:[%s2678_s1 + $0x248] sm:$0xff]  ;;  %v1541_v15 = vpack.c.bf16 %v142_v10, %v141_v9  ;;  %v129_v16 = vld [vmem:[%s2678_s1 + $0x2d0] sm:$0xff]  ;;  %v130_v17 = vld [vmem:[%s2678_s1 + $0x2d8] sm:$0xff] }
  0x22   :  { %1500 = vmatprep.subr.bf16.mxu0 %v1499_v36  ;;  %v143_v18 = vld [vmem:[%s2678_s1 + $0x340] sm:$0xff]  ;;  %v144_v19 = vld [vmem:[%s2678_s1 + $0x348] sm:$0xff]  ;;  %v1517_v20 = vpack.c.bf16 %v112_v14, %v111_v13  ;;  %v1519_v21 = vpack.c.bf16 %v130_v17, %v129_v16  ;;  %v113_v22 = vld [vmem:[%s2678_s1 + $0x250] sm:$0xff] }
  0x23   :  { %1498 = vmatpush3.bf16.msra.mxu1 %v1497_v35  ;;  %v114_v23 = vld [vmem:[%s2678_s1 + $0x258] sm:$0xff]  ;;  %v1544_v24 = vpack.c.bf16 %v144_v19, %v143_v18  ;;  %v131_v25 = vld [vmem:[%s2678_s1 + $0x2e0] sm:$0xff]  ;;  %v132_v26 = vld [vmem:[%s2678_s1 + $0x2e8] sm:$0xff] }
  0x24   :  { %1531 = vmatprep.subr.bf16.mxu1 %v1754_v51  ;;  %223 = vmatmul.mubr.f32.vlgmr.msra.gmra.mrb[0].mxu0 %v32_v43  ;;  %v145_v27 = vld [vmem:[%s2678_s1 + $0x350] sm:$0xff]  ;;  %v146_v28 = vld [vmem:[%s2678_s1 + $0x358] sm:$0xff]  ;;  %v1521_v29 = vpack.c.bf16 %v114_v23, %v113_v22  ;;  %v1523_v30 = vpack.c.bf16 %v132_v26, %v131_v25  ;;  %v115_v31 = vld [vmem:[%s2678_s1 + $0x260] sm:$0xff] }
  0x25   :  { %1502 = vmatpush3.bf16.msra.mxu0 %v1501_v44  ;;  %362 = vmatprep.mubr.f32.mxu0 %v37_v0  ;;  %v116_v32 = vld [vmem:[%s2678_s1 + $0x268] sm:$0xff]  ;;  %v1547_v33 = vpack.c.bf16 %v146_v28, %v145_v27  ;;  %v133_v34 = vld [vmem:[%s2678_s1 + $0x2f0] sm:$0xff]  ;;  %v134_v35 = vld [vmem:[%s2678_s1 + $0x2f8] sm:$0xff] }
  0x26   :  { %293 = vmatmul.mubr.f32.vlgmr.msra.gmra.mrb[0].mxu1 %v34_v45  ;;  %1504 = vmatprep.subr.bf16.mxu0 %v1503_v46  ;;  %v147_v36 = vld [vmem:[%s2678_s1 + $0x360] sm:$0xff]  ;;  %v148_v37 = vld [vmem:[%s2678_s1 + $0x368] sm:$0xff]  ;;  %v1525_v38 = vpack.c.bf16 %v116_v32, %v115_v31  ;;  %v1527_v39 = vpack.c.bf16 %v134_v35, %v133_v34  ;;  %v117_v40 = vld [vmem:[%s2678_s1 + $0x270] sm:$0xff] }
  0x27   :  { %1533 = vmatpush3.bf16.msra.mxu1 %v1532_v49  ;;  %1327 = vmatprep.mubr.msk.f32.mxu1 %vm1755_vm0, %v1756_v1  ;;  %v118_v41 = vld [vmem:[%s2678_s1 + $0x278] sm:$0xff]  ;;  %v1550_v42 = vpack.c.bf16 %v148_v37, %v147_v36  ;;  %v149_v43 = vld [vmem:[%s2678_s1 + $0x370] sm:$0xff]  ;;  %v36_v47 = vld [vmem:[%s2679_s0 + $0x20] sm:$0xff] }
  0x28   :  { %1534 = vmatprep.subr.bf16.mxu1 %v1754_v51  ;;  %v150_v44 = vld [vmem:[%s2678_s1 + $0x378] sm:$0xff]  ;;  %v1529_v45 = vpack.c.bf16 %v118_v41, %v117_v40  ;;  %v38_v48 = vld [vmem:[%s2679_s0 + $0x30] sm:$0xff]  ;;  %v439_v49 = vld [vmem:[%s2680_s3] sm:$0xff] }
  0x29   :  { %1506 = vmatpush3.bf16.msra.mxu0 %v1505_v55  ;;  %v1553_v46 = vpack.c.bf16 %v150_v44, %v149_v43  ;;  %v440_v50 = vld [vmem:[%s2680_s3 + $0x8] sm:$0xff]  ;;  %v441_v52 = vld [vmem:[%s2680_s3 + $0x10] sm:$0xff]  ;;  %v442_v54 = vld [vmem:[%s2680_s3 + $0x18] sm:$0xff] }
  0x2a   :  { %1508 = vmatprep.subr.bf16.mxu0 %v1507_v57  ;;  %v1556_v53 = vpack.c.bf16 %v440_v50, %v439_v49  ;;  %v1559_v55 = vpack.c.bf16 %v442_v54, %v441_v52  ;;  %v443_v56 = vld [vmem:[%s2680_s3 + $0x20] sm:$0xff]  ;;  %v444_v57 = vld [vmem:[%s2680_s3 + $0x28] sm:$0xff]  ;;  %v446_v60 = vld [vmem:[%s2680_s3 + $0x38] sm:$0xff] }
  0x2b   :  { %1536 = vmatpush3.bf16.msra.mxu1 %v1535_v59  ;;  %v1562_v58 = vpack.c.bf16 %v444_v57, %v443_v56  ;;  %v445_v59 = vld [vmem:[%s2680_s3 + $0x30] sm:$0xff]  ;;  %v447_v62 = vld [vmem:[%s2680_s3 + $0x40] sm:$0xff]  ;;  %v448_v63 = vld [vmem:[%s2680_s3 + $0x48] sm:$0xff] }
  0x2c   :  { %1537 = vmatprep.subr.bf16.mxu1 %v1754_v51  ;;  %v1565_v61 = vpack.c.bf16 %v446_v60, %v445_v59  ;;  %v1568_v0 = vpack.c.bf16 %v448_v63, %v447_v62  ;;  %v451_v5 = vld [vmem:[%s2680_s3 + $0x60] sm:$0xff]  ;;  %v453_v8 = vld [vmem:[%s2680_s3 + $0x70] sm:$0xff]  ;;  %v454_v9 = vld [vmem:[%s2680_s3 + $0x78] sm:$0xff] }
  0x2d   :  { %1510 = vmatpush3.bf16.msra.mxu0 %v1509_v2  ;;  %v449_v2 = vld [vmem:[%s2680_s3 + $0x50] sm:$0xff]  ;;  %v1577_v10 = vpack.c.bf16 %v454_v9, %v453_v8  ;;  %v537_v17 = vld [vmem:[%s2681_s5 + $0x20] sm:$0xff]  ;;  %v538_v18 = vld [vmem:[%s2681_s5 + $0x28] sm:$0xff] }
  0x2e   :  { %1512 = vmatprep.subr.bf16.mxu0 %v1511_v3  ;;  %v450_v3 = vld [vmem:[%s2680_s3 + $0x58] sm:$0xff]  ;;  %v535_v13 = vld [vmem:[%s2681_s5 + $0x10] sm:$0xff]  ;;  %v1586_v19 = vpack.c.bf16 %v538_v18, %v537_v17  ;;  %v541_v23 = vld [vmem:[%s2681_s5 + $0x40] sm:$0xff] }
  0x2f   :  { %1539 = vmatpush3.bf16.msra.mxu1 %v1538_v6  ;;  %v1571_v4 = vpack.c.bf16 %v450_v3, %v449_v2  ;;  %v452_v6 = vld [vmem:[%s2680_s3 + $0x68] sm:$0xff]  ;;  %v543_v26 = vld [vmem:[%s2681_s5 + $0x50] sm:$0xff]  ;;  %v544_v27 = vld [vmem:[%s2681_s5 + $0x58] sm:$0xff] }
  0x30   :  { %1540 = vmatprep.subr.bf16.mxu1 %v1754_v51  ;;  %v1574_v7 = vpack.c.bf16 %v452_v6, %v451_v5  ;;  %v1595_v28 = vpack.c.bf16 %v544_v27, %v543_v26  ;;  %v547_v49 = vld [vmem:[%s2681_s5 + $0x70] sm:$0xff]  ;;  %v548_v50 = vld [vmem:[%s2681_s5 + $0x78] sm:$0xff]  ;;  %v635_v54 = vld [vmem:[%s2683_s7 + $0x40] sm:$0xff] }
  0x31   :  { %1514 = vmatpush3.bf16.msra.mxu0 %v1513_v11  ;;  %v533_v11 = vld [vmem:[%s2681_s5] sm:$0xff]  ;;  %v1601_v52 = vpack.c.bf16 %v548_v50, %v547_v49  ;;  %v637_v57 = vld [vmem:[%s2683_s7 + $0x50] sm:$0xff]  ;;  %v634_v59 = vld [vmem:[%s2683_s7 + $0x38] sm:$0xff] }
  0x32   :  { %1516 = vmatprep.subr.bf16.mxu0 %v1515_v12  ;;  %v534_v12 = vld [vmem:[%s2681_s5 + $0x8] sm:$0xff]  ;;  %v642_v62 = vld [vmem:[%s2683_s7 + $0x78] sm:$0xff]  ;;  %v649_v63 = vld [vmem:[%s2683_s7 + $0xb0] sm:$0xff] }
  0x33   :  { %1542 = vmatpush3.bf16.msra.mxu1 %v1541_v15  ;;  %v1580_v14 = vpack.c.bf16 %v534_v12, %v533_v11  ;;  %v536_v15 = vld [vmem:[%s2681_s5 + $0x18] sm:$0xff]  ;;  %v641_v2 = vld [vmem:[%s2683_s7 + $0x70] sm:$0xff]  ;;  %v648_v3 = vld [vmem:[%s2683_s7 + $0xa8] sm:$0xff] }
  0x34   :  { %1543 = vmatprep.subr.bf16.mxu1 %v1754_v51  ;;  %v1583_v16 = vpack.c.bf16 %v536_v15, %v535_v13  ;;  %v656_v5 = vld [vmem:[%s2683_s7 + $0xe8] sm:$0xff]  ;;  %v663_v6 = vld [vmem:[%s2683_s7 + $0x120] sm:$0xff]  ;;  %v662_v9 = vld [vmem:[%s2683_s7 + $0x118] sm:$0xff] }
  0x35   :  { %1518 = vmatpush3.bf16.msra.mxu0 %v1517_v20  ;;  %v539_v20 = vld [vmem:[%s2681_s5 + $0x30] sm:$0xff]  ;;  %v655_v8 = vld [vmem:[%s2683_s7 + $0xe0] sm:$0xff]  ;;  %v670_v11 = vld [vmem:[%s2683_s7 + $0x158] sm:$0xff] }
  0x36   :  { %1520 = vmatprep.subr.bf16.mxu0 %v1519_v21  ;;  %v540_v21 = vld [vmem:[%s2681_s5 + $0x38] sm:$0xff]  ;;  %v677_v12 = vld [vmem:[%s2683_s7 + $0x190] sm:$0xff]  ;;  %v676_v15 = vld [vmem:[%s2683_s7 + $0x188] sm:$0xff] }
  0x37   :  { %1545 = vmatpush3.bf16.msra.mxu1 %v1544_v24  ;;  %v1589_v22 = vpack.c.bf16 %v540_v21, %v539_v20  ;;  %v542_v24 = vld [vmem:[%s2681_s5 + $0x48] sm:$0xff]  ;;  %v1615_v13 = vpack.c.bf16 %v677_v12, %v670_v11  ;;  %v691_v18 = vld [vmem:[%s2683_s7 + $0x200] sm:$0xff]  ;;  %v690_v21 = vld [vmem:[%s2683_s7 + $0x1f8] sm:$0xff] }
  0x38   :  { %1546 = vmatprep.subr.bf16.mxu1 %v1754_v51  ;;  %v1592_v25 = vpack.c.bf16 %v542_v24, %v541_v23  ;;  %v684_v17 = vld [vmem:[%s2683_s7 + $0x1c8] sm:$0xff]  ;;  %v683_v20 = vld [vmem:[%s2683_s7 + $0x1c0] sm:$0xff]  ;;  %v698_v23 = vld [vmem:[%s2683_s7 + $0x238] sm:$0xff] }
  0x39   :  { %1522 = vmatpush3.bf16.msra.mxu0 %v1521_v29  ;;  %v545_v29 = vld [vmem:[%s2681_s5 + $0x60] sm:$0xff]  ;;  %v705_v24 = vld [vmem:[%s2683_s7 + $0x270] sm:$0xff]  ;;  %v704_v27 = vld [vmem:[%s2683_s7 + $0x268] sm:$0xff] }
  0x3a   :  { %1524 = vmatprep.subr.bf16.mxu0 %v1523_v30  ;;  %v546_v30 = vld [vmem:[%s2681_s5 + $0x68] sm:$0xff]  ;;  %v697_v26 = vld [vmem:[%s2683_s7 + $0x230] sm:$0xff] }
  0x3b   :  { %1548 = vmatpush3.bf16.msra.mxu1 %v1547_v33  ;;  %v1598_v31 = vpack.c.bf16 %v546_v30, %v545_v29  ;;  %v1112_v33 = vld [vmem:[%s2682_s2] ss:$0 sm:$0xff]  ;;  %v712_v29 = vld [vmem:[%s2683_s7 + $0x2a8] sm:$0xff]  ;;  %v665_v49 = vld [vmem:[%s2683_s7 + $0x130] sm:$0xff] }
  0x3c   :  { %1549 = vmatprep.subr.bf16.mxu1 %v1754_v51  ;;  %v719_v30 = vld [vmem:[%s2683_s7 + $0x2e0] sm:$0xff]  ;;  %v721_v11 = vld [vmem:[%s2683_s7 + $0x2f0] sm:$0xff] }
  0x3d   :  { %1526 = vmatpush3.bf16.msra.mxu0 %v1525_v38 }
  0x3e   :  { %1528 = vmatprep.subr.bf16.mxu0 %v1527_v39 }
  0x3f   :  { %1551 = vmatpush3.bf16.msra.mxu1 %v1550_v42 }
  0x40   :  { %1552 = vmatprep.subr.bf16.mxu1 %v1754_v51 }
  0x41   :  { %1530 = vmatpush3.bf16.msra.mxu0 %v1529_v45 }
  0x42   :  { %1555 = vmatprep.subr.bf16.mxu0 %v1754_v51 }
  0x43   :  { %1554 = vmatpush3.bf16.msra.mxu1 %v1553_v46 }
  0x44   :  { %1579 = vmatprep.subr.bf16.mxu1 %v1754_v51  ;;  %363 = vmatmul.mubr.f32.vlgmr.msra.gmra.mrb[2].mxu0 %v36_v47 }
  0x45   :  { %1362 = vmatprep.mubr.msk.f32.mxu0 %vm1755_vm0, %v1756_v1  ;;  %1557 = vmatpush3.bf16.msra.mxu0 %v1556_v53  ;;  %v628_v53 = vld [vmem:[%s2683_s7 + $0x8] sm:$0xff] }
  0x46   :  { %1328 = vmatmul.mubr.f32.vlgmr.msra.gmra.mrb[2].mxu1 %v38_v48  ;;  %1558 = vmatprep.subr.bf16.mxu0 %v1754_v51  ;;  %v1603_v56 = vpack.c.bf16 %v635_v54, %v628_v53  ;;  %v657_v53 = vld [vmem:[%s2683_s7 + $0xf0] sm:$0xff]  ;;  %v664_v54 = vld [vmem:[%s2683_s7 + $0x128] sm:$0xff] }
  0x47   :  { %1397 = vmatprep.mubr.msk.f32.mxu1 %vm1755_vm0, %v1756_v1  ;;  %1581 = vmatpush3.bf16.msra.mxu1 %v1580_v14  ;;  %v669_v14 = vld [vmem:[%s2683_s7 + $0x150] sm:$0xff] }
  0x48   :  { %1582 = vmatprep.subr.bf16.mxu1 %v1754_v51 }
  0x49   :  { %1560 = vmatpush3.bf16.msra.mxu0 %v1559_v55  ;;  %v630_v55 = vld [vmem:[%s2683_s7 + $0x18] sm:$0xff] }
  0x4a   :  { %1561 = vmatprep.subr.bf16.mxu0 %v1754_v51  ;;  %v1635_v60 = vpack.c.bf16 %v637_v57, %v630_v55  ;;  %v672_v55 = vld [vmem:[%s2683_s7 + $0x168] sm:$0xff]  ;;  %v1645_v57 = vpack.c.bf16 %v664_v54, %v657_v53 }
  0x4b   :  { %1584 = vmatpush3.bf16.msra.mxu1 %v1583_v16  ;;  %v1617_v16 = vpack.c.bf16 %v676_v15, %v669_v14  ;;  %v713_v14 = vld [vmem:[%s2683_s7 + $0x2b0] sm:$0xff]  ;;  %v720_v15 = vld [vmem:[%s2683_s7 + $0x2e8] sm:$0xff] }
  0x4c   :  { %1585 = vmatprep.subr.bf16.mxu1 %v1754_v51 }
  0x4d   :  { %1563 = vmatpush3.bf16.msra.mxu0 %v1562_v58  ;;  %v627_v58 = vld [vmem:[%s2683_s7] sm:$0xff] }
  0x4e   :  { %1564 = vmatprep.subr.bf16.mxu0 %v1754_v51 }
  0x4f   :  { %1587 = vmatpush3.bf16.msra.mxu1 %v1586_v19  ;;  %v1619_v19 = vpack.c.bf16 %v691_v18, %v684_v17  ;;  %v726_v17 = vld [vmem:[%s2683_s7 + $0x318] sm:$0xff]  ;;  %v733_v18 = vld [vmem:[%s2683_s7 + $0x350] sm:$0xff] }
  0x50   :  { %1588 = vmatprep.subr.bf16.mxu1 %v1754_v51 }
  0x51   :  { %1566 = vmatpush3.bf16.msra.mxu0 %v1565_v61  ;;  %v1605_v61 = vpack.c.bf16 %v634_v59, %v627_v58  ;;  %v671_v59 = vld [vmem:[%s2683_s7 + $0x160] sm:$0xff] }
  0x52   :  { %1567 = vmatprep.subr.bf16.mxu0 %v1754_v51 }
  0x53   :  { %1590 = vmatpush3.bf16.msra.mxu1 %v1589_v22  ;;  %v1621_v22 = vpack.c.bf16 %v690_v21, %v683_v20  ;;  %v1631_v20 = vpack.c.bf16 %v733_v18, %v726_v17  ;;  %v735_v21 = vld [vmem:[%s2683_s7 + $0x360] sm:$0xff]  ;;  %v701_v18 = vld [vmem:[%s2683_s7 + $0x250] sm:$0xff] }
  0x54   :  { %1591 = vmatprep.subr.bf16.mxu1 %v1754_v51 }
  0x55   :  { %1569 = vmatpush3.bf16.msra.mxu0 %v1568_v0  ;;  %v1607_v0 = vpack.c.bf16 %v649_v63, %v642_v62  ;;  %v693_v62 = vld [vmem:[%s2683_s7 + $0x210] sm:$0xff] }
  0x56   :  { %1570 = vmatprep.subr.bf16.mxu0 %v1754_v51 }
  0x57   :  { %1593 = vmatpush3.bf16.msra.mxu1 %v1592_v25  ;;  %v1623_v25 = vpack.c.bf16 %v705_v24, %v698_v23  ;;  %v732_v23 = vld [vmem:[%s2683_s7 + $0x348] sm:$0xff] }
  0x58   :  { %1594 = vmatprep.subr.bf16.mxu1 %v1754_v51 }
  0x59   :  { %1572 = vmatpush3.bf16.msra.mxu0 %v1571_v4  ;;  %v1609_v4 = vpack.c.bf16 %v648_v3, %v641_v2  ;;  %v685_v2 = vld [vmem:[%s2683_s7 + $0x1d0] sm:$0xff]  ;;  %v692_v3 = vld [vmem:[%s2683_s7 + $0x208] sm:$0xff] }
  0x5a   :  { %1573 = vmatprep.subr.bf16.mxu0 %v1754_v51 }
  0x5b   :  { %1596 = vmatpush3.bf16.msra.mxu1 %v1595_v28  ;;  %v1625_v28 = vpack.c.bf16 %v704_v27, %v697_v26  ;;  %v727_v26 = vld [vmem:[%s2683_s7 + $0x320] sm:$0xff]  ;;  %v734_v27 = vld [vmem:[%s2683_s7 + $0x358] sm:$0xff] }
  0x5c   :  { %1597 = vmatprep.subr.bf16.mxu1 %v1754_v51 }
  0x5d   :  { %1575 = vmatpush3.bf16.msra.mxu0 %v1574_v7  ;;  %v1611_v7 = vpack.c.bf16 %v663_v6, %v656_v5  ;;  %v707_v5 = vld [vmem:[%s2683_s7 + $0x280] sm:$0xff]  ;;  %v1653_v6 = vpack.c.bf16 %v692_v3, %v685_v2  ;;  %v680_v3 = vld [vmem:[%s2683_s7 + $0x1a8] sm:$0xff] }
  0x5e   :  { %1576 = vmatprep.subr.bf16.mxu0 %v1754_v51 }
  0x5f   :  { %1599 = vmatpush3.bf16.msra.mxu1 %v1598_v31  ;;  %v1627_v31 = vpack.c.bf16 %v719_v30, %v712_v29  ;;  %v632_v29 = vld [vmem:[%s2683_s7 + $0x28] sm:$0xff]  ;;  %v639_v30 = vld [vmem:[%s2683_s7 + $0x60] sm:$0xff] }
  0x60   :  { %1600 = vmatprep.subr.bf16.mxu1 %v1754_v51 }
  0x61   :  { %1578 = vmatpush3.bf16.msra.mxu0 %v1577_v10  ;;  %v1613_v10 = vpack.c.bf16 %v662_v9, %v655_v8  ;;  %v699_v8 = vld [vmem:[%s2683_s7 + $0x240] sm:$0xff]  ;;  %v706_v9 = vld [vmem:[%s2683_s7 + $0x278] sm:$0xff] }
  0x62   :  { %1604 = vmatprep.subr.bf16.mxu0 %v1603_v56  ;;  %v679_v56 = vld [vmem:[%s2683_s7 + $0x1a0] sm:$0xff]  ;;  %v1657_v12 = vpack.c.bf16 %v706_v9, %v699_v8 }
  0x63   :  { %1602 = vmatpush3.bf16.msra.mxu1 %v1601_v52  ;;  %v1647_v58 = vpack.c.bf16 %v679_v56, %v672_v55  ;;  %v659_v55 = vld [vmem:[%s2683_s7 + $0x100] sm:$0xff] }
  0x64   :  { %1636 = vmatprep.subr.bf16.mxu1 %v1635_v60  ;;  %v678_v60 = vld [vmem:[%s2683_s7 + $0x198] sm:$0xff]  ;;  %v687_v9 = vld [vmem:[%s2683_s7 + $0x1e0] sm:$0xff] }
  0x65   :  { %v1649_v63 = vpack.c.bf16 %v678_v60, %v671_v59  ;;  %v668_v59 = vld [vmem:[%s2683_s7 + $0x148] sm:$0xff]  ;;  %v674_v60 = vld [vmem:[%s2683_s7 + $0x178] sm:$0xff] }
  0xf7   :  { %v1154_v32 = vpop.f32.mrb[0].mxu0 }
  0xf8   :  { %v1155_v34 = vpop.f32.mrb[1].mxu0 }
  0xf9   :  { %v1189_v35 = vpop.f32.mrb[0].mxu1  ;;  %v1156_v36 = vadd.f32 %v1155_v34, %v1154_v32  ;;  %v711_v32 = vld [vmem:[%s2683_s7 + $0x2a0] sm:$0xff] }
  0xfa   :  { %v1190_v37 = vpop.f32.mrb[1].mxu1 }
  0xfb   :  { %v1191_v38 = vadd.f32 %v1190_v37, %v1189_v35  ;;  %v225_v39 = vadd.f32 %v1156_v36, %v1112_v33  ;;  %v718_v33 = vld [vmem:[%s2683_s7 + $0x2d8] sm:$0xff]  ;;  %v1113_v35 = vld [vmem:[%s2684_s4] ss:$0 sm:$0xff]  ;;  %v629_v36 = vld [vmem:[%s2683_s7 + $0x10] sm:$0xff] }
  0xfc   :  { %v1629_v34 = vpack.c.bf16 %v718_v33, %v711_v32  ;;  %v636_v37 = vld [vmem:[%s2683_s7 + $0x48] sm:$0xff]  ;;  %v1114_v32 = vld [vmem:[%s2685_s6] ss:$0 sm:$0xff] }
  0xfd   :  { %v295_v40 = vadd.f32 %v1191_v38, %v225_v39  ;;  %v644_v39 = vld [vmem:[%s2683_s7 + $0x88] sm:$0xff]  ;;  %v631_v33 = vld [vmem:[%s2683_s7 + $0x20] sm:$0xff] }
 0x117   :  { %v1224_v41 = vpop.f32.mrb[2].mxu0 }
 0x118   :  { %v1225_v42 = vpop.f32.mrb[3].mxu0 }
 0x119   :  { %v434_v43 = vpop.f32.mrb[2].mxu1  ;;  %v1226_v44 = vadd.f32 %v1225_v42, %v1224_v41 }
 0x11a   :  { %v1329_v45 = vpop.f32.mrb[3].mxu1 }
 0x11b   :  { %v365_v46 = vadd.f32 %v1226_v44, %v295_v40  ;;  %v651_v40 = vld [vmem:[%s2683_s7 + $0xc0] sm:$0xff] }
 0x11c   :  { %v1639_v45 = vpack.c.bf16 %v651_v40, %v644_v39  ;;  %v653_v39 = vld [vmem:[%s2683_s7 + $0xd0] sm:$0xff] }
 0x11d   :  { %v435_v47 = vadd.f32 %v434_v43, %v365_v46  ;;  %v1637_v43 = vpack.c.bf16 %v636_v37, %v629_v36  ;;  %v643_v46 = vld [vmem:[%s2683_s7 + $0x80] sm:$0xff]  ;;  %v640_v36 = vld [vmem:[%s2683_s7 + $0x68] sm:$0xff] }
 0x11f   :  { %v438_v48 = vmax.f32 %v435_v47, 0.0  ;;  %v650_v47 = vld [vmem:[%s2683_s7 + $0xb8] sm:$0xff] }
 0x120   :  { %v1641_v50 = vpack.c.bf16 %v650_v47, %v643_v46  ;;  %v652_v47 = vld [vmem:[%s2683_s7 + $0xc8] sm:$0xff] }
 0x121   :  { %1363 = vmatmul.mubr.f32.vlgmr.msra.gmra.mrb[4].mxu0 %v438_v48  ;;  %v658_v48 = vld [vmem:[%s2683_s7 + $0xf8] sm:$0xff] }
 0x122   :  { %840 = vmatprep.mubr.f32.mxu0 %v1756_v1  ;;  %1606 = vmatpush1.bf16.msra.mxu0 %v1605_v61  ;;  %v1643_v52 = vpack.c.bf16 %v665_v49, %v658_v48  ;;  %v686_v61 = vld [vmem:[%s2683_s7 + $0x1d8] sm:$0xff]  ;;  %v647_v48 = vld [vmem:[%s2683_s7 + $0xa0] sm:$0xff] }
 0x123   :  { %1608 = vmatprep.subr.bf16.mxu0 %v1607_v0  ;;  %v1651_v0 = vpack.c.bf16 %v693_v62, %v686_v61  ;;  %v654_v49 = vld [vmem:[%s2683_s7 + $0xd8] sm:$0xff]  ;;  %v681_v61 = vld [vmem:[%s2683_s7 + $0x1b0] sm:$0xff] }
 0x124   :  { %v1703_v54 = vpack.c.bf16 %v654_v49, %v647_v48  ;;  %v1679_v2 = vpack.c.bf16 %v681_v61, %v674_v60  ;;  %v739_v48 = vld [vmem:[%s2686_s8] sm:$0xff] }
 0x126   :  { %1610 = vmatpush1.bf16.msra.mxu0 %v1609_v4  ;;  %v700_v4 = vld [vmem:[%s2683_s7 + $0x248] sm:$0xff] }
 0x127   :  { %1612 = vmatprep.subr.bf16.mxu0 %v1611_v7  ;;  %v1655_v7 = vpack.c.bf16 %v707_v5, %v700_v4  ;;  %v682_v4 = vld [vmem:[%s2683_s7 + $0x1b8] sm:$0xff]  ;;  %v688_v5 = vld [vmem:[%s2683_s7 + $0x1e8] sm:$0xff] }
 0x12a   :  { %1614 = vmatpush1.bf16.msra.mxu0 %v1613_v10  ;;  %v714_v10 = vld [vmem:[%s2683_s7 + $0x2b8] sm:$0xff] }
 0x12b   :  { %1616 = vmatprep.subr.bf16.mxu0 %v1615_v13  ;;  %v1659_v13 = vpack.c.bf16 %v721_v11, %v714_v10  ;;  %v694_v11 = vld [vmem:[%s2683_s7 + $0x218] sm:$0xff] }
 0x12e   :  { %1618 = vmatpush1.bf16.msra.mxu0 %v1617_v16  ;;  %v1661_v16 = vpack.c.bf16 %v720_v15, %v713_v14  ;;  %v702_v14 = vld [vmem:[%s2683_s7 + $0x258] sm:$0xff]  ;;  %v709_v15 = vld [vmem:[%s2683_s7 + $0x290] sm:$0xff] }
 0x12f   :  { %1620 = vmatprep.subr.bf16.mxu0 %v1619_v19  ;;  %v728_v19 = vld [vmem:[%s2683_s7 + $0x328] sm:$0xff] }
 0x130   :  { %v1663_v24 = vpack.c.bf16 %v735_v21, %v728_v19  ;;  %v1687_v19 = vpack.c.bf16 %v709_v15, %v702_v14  ;;  %v703_v21 = vld [vmem:[%s2683_s7 + $0x260] sm:$0xff] }
 0x132   :  { %1622 = vmatpush1.bf16.msra.mxu0 %v1621_v22  ;;  %v725_v22 = vld [vmem:[%s2683_s7 + $0x310] sm:$0xff] }
 0x133   :  { %1624 = vmatprep.subr.bf16.mxu0 %v1623_v25  ;;  %v1633_v25 = vpack.c.bf16 %v732_v23, %v725_v22  ;;  %v710_v22 = vld [vmem:[%s2683_s7 + $0x298] sm:$0xff]  ;;  %v716_v23 = vld [vmem:[%s2683_s7 + $0x2c8] sm:$0xff] }
 0x136   :  { %1626 = vmatpush1.bf16.msra.mxu0 %v1625_v28  ;;  %v1665_v28 = vpack.c.bf16 %v734_v27, %v727_v26  ;;  %v1715_v26 = vpack.c.bf16 %v710_v22, %v703_v21  ;;  %v715_v27 = vld [vmem:[%s2683_s7 + $0x2c0] sm:$0xff] }
 0x137   :  { %1628 = vmatprep.subr.bf16.mxu0 %v1627_v31  ;;  %v1667_v31 = vpack.c.bf16 %v639_v30, %v632_v29  ;;  %v722_v29 = vld [vmem:[%s2683_s7 + $0x2f8] sm:$0xff]  ;;  %v717_v30 = vld [vmem:[%s2683_s7 + $0x2d0] sm:$0xff] }
 0x13a   :  { %1630 = vmatpush1.bf16.msra.mxu0 %v1629_v34  ;;  %v638_v34 = vld [vmem:[%s2683_s7 + $0x58] sm:$0xff] }
 0x13b   :  { %1632 = vmatprep.subr.bf16.mxu0 %v1631_v20  ;;  %v708_v20 = vld [vmem:[%s2683_s7 + $0x288] sm:$0xff] }
 0x13e   :  { %1634 = vmatpush1.bf16.msra.mxu0 %v1633_v25  ;;  %v1689_v25 = vpack.c.bf16 %v708_v20, %v701_v18 }
 0x13f   :  { %1668 = vmatprep.subr.bf16.mxu0 %v1667_v31  ;;  %v724_v31 = vld [vmem:[%s2683_s7 + $0x308] sm:$0xff] }
 0x1f4   :  { %v528_v38 = vpop.f32.mrb[4].mxu0 }
 0x1f5   :  { %v529_v41 = vadd.f32 %v1113_v35, %v528_v38  ;;  %v1364_v42 = vpop.f32.mrb[5].mxu0  ;;  %v633_v35 = vld [vmem:[%s2683_s7 + $0x30] sm:$0xff]  ;;  %v646_v38 = vld [vmem:[%s2683_s7 + $0x98] sm:$0xff] }
 0x1f6   :  { %v1669_v42 = vpack.c.bf16 %v638_v34, %v631_v33  ;;  %v1671_v46 = vpack.c.bf16 %v653_v39, %v646_v38  ;;  %v737_v33 = vld [vmem:[%s2683_s7 + $0x370] sm:$0xff]  ;;  %v1693_v34 = vpack.c.bf16 %v722_v29, %v715_v27  ;;  %v736_v38 = vld [vmem:[%s2683_s7 + $0x368] sm:$0xff]  ;;  %v731_v39 = vld [vmem:[%s2683_s7 + $0x340] sm:$0xff] }
 0x1f7   :  { %v532_v44 = vmax.f32 %v529_v41, 0.0 }
 0x1f9   :  { %1398 = vmatmul.mubr.f32.vlgmr.msra.gmra.mrb[4].mxu1 %v532_v44  ;;  %v645_v44 = vld [vmem:[%s2683_s7 + $0x90] sm:$0xff] }
 0x1fa   :  { %1638 = vmatpush1.bf16.msra.mxu1 %v1637_v43  ;;  %911 = vmatprep.mubr.f32.mxu1 %v1756_v1  ;;  %v1700_v43 = vpack.c.bf16 %v640_v36, %v633_v35  ;;  %v1673_v53 = vpack.c.bf16 %v652_v47, %v645_v44  ;;  %v1718_v35 = vpack.c.bf16 %v724_v31, %v717_v30  ;;  %v729_v36 = vld [vmem:[%s2683_s7 + $0x330] sm:$0xff] }
 0x1fb   :  { %1640 = vmatprep.subr.bf16.mxu1 %v1639_v45 }
 0x1fe   :  { %1642 = vmatpush1.bf16.msra.mxu1 %v1641_v50  ;;  %v660_v50 = vld [vmem:[%s2683_s7 + $0x108] sm:$0xff] }
 0x1ff   :  { %1644 = vmatprep.subr.bf16.mxu1 %v1643_v52  ;;  %v667_v52 = vld [vmem:[%s2683_s7 + $0x140] sm:$0xff] }
 0x200   :  { %v1675_v56 = vpack.c.bf16 %v667_v52, %v660_v50 }
 0x202   :  { %1646 = vmatpush1.bf16.msra.mxu1 %v1645_v57  ;;  %v666_v57 = vld [vmem:[%s2683_s7 + $0x138] sm:$0xff] }
 0x203   :  { %1648 = vmatprep.subr.bf16.mxu1 %v1647_v58  ;;  %v661_v58 = vld [vmem:[%s2683_s7 + $0x110] sm:$0xff]  ;;  %v1677_v62 = vpack.c.bf16 %v666_v57, %v659_v55 }
 0x206   :  { %1650 = vmatpush1.bf16.msra.mxu1 %v1649_v63  ;;  %v1706_v63 = vpack.c.bf16 %v668_v59, %v661_v58 }
 0x207   :  { %1652 = vmatprep.subr.bf16.mxu1 %v1651_v0  ;;  %v673_v0 = vld [vmem:[%s2683_s7 + $0x170] sm:$0xff] }
 0x20a   :  { %1654 = vmatpush1.bf16.msra.mxu1 %v1653_v6  ;;  %v695_v6 = vld [vmem:[%s2683_s7 + $0x220] sm:$0xff] }
 0x20b   :  { %1656 = vmatprep.subr.bf16.mxu1 %v1655_v7  ;;  %v1681_v7 = vpack.c.bf16 %v680_v3, %v673_v0  ;;  %v1683_v10 = vpack.c.bf16 %v695_v6, %v688_v5 }
 0x20e   :  { %1658 = vmatpush1.bf16.msra.mxu1 %v1657_v12  ;;  %v689_v12 = vld [vmem:[%s2683_s7 + $0x1f0] sm:$0xff] }
 0x20f   :  { %1660 = vmatprep.subr.bf16.mxu1 %v1659_v13  ;;  %v696_v13 = vld [vmem:[%s2683_s7 + $0x228] sm:$0xff] }
 0x210   :  { %v1712_v17 = vpack.c.bf16 %v696_v13, %v689_v12 }
 0x212   :  { %1662 = vmatpush1.bf16.msra.mxu1 %v1661_v16  ;;  %v1685_v16 = vpack.c.bf16 %v694_v11, %v687_v9 }
 0x213   :  { %1664 = vmatprep.subr.bf16.mxu1 %v1663_v24  ;;  %v723_v24 = vld [vmem:[%s2683_s7 + $0x300] sm:$0xff] }
 0x216   :  { %1666 = vmatpush1.bf16.msra.mxu1 %v1665_v28  ;;  %v1691_v28 = vpack.c.bf16 %v723_v24, %v716_v23 }
 0x217   :  { %1699 = vmatprep.subr.bf16.mxu1 %v1754_v51 }
 0x2cc   :  { %v622_v37 = vpop.f32.mrb[4].mxu1 }
 0x2cd   :  { %v623_v40 = vadd.f32 %v1114_v32, %v622_v37  ;;  %v1399_v41 = vpop.f32.mrb[5].mxu1  ;;  %v730_v32 = vld [vmem:[%s2683_s7 + $0x338] sm:$0xff] }
 0x2ce   :  { %v1695_v37 = vpack.c.bf16 %v737_v33, %v730_v32  ;;  %v1697_v41 = vpack.c.bf16 %v736_v38, %v729_v36 }
 0x2cf   :  { %v2521_v45 = vmax.f32 %v623_v40, 0.0  ;;  %v738_v40 = vld [vmem:[%s2683_s7 + $0x378] sm:$0xff] }
 0x2d1   :  { %841 = vmatmul.mubr.f32.vlgmr.msra.gmra.mrb[6].mxu0 %v2521_v45  ;;  %912 = vmatmul.mubr.f32.vlgmr.msra.gmra.mrb[6].mxu1 %v2521_v45 }
 0x2d2   :  { %1670 = vmatpush1.bf16.msra.mxu0 %v1669_v42  ;;  %1701 = vmatpush3.bf16.msra.mxu1 %v1700_v43  ;;  %v1721_v42 = vpack.c.bf16 %v738_v40, %v731_v39  ;;  %v741_v43 = vlaneseq }
 0x2d3   :  { %1672 = vmatprep.subr.bf16.mxu0 %v1671_v46  ;;  %1702 = vmatprep.subr.bf16.mxu1 %v1754_v51 }
 0x2d4   :  { %982 = vmatprep.mubr.f32.mxu0 %v1756_v1  ;;  %1432 = vmatprep.mubr.msk.f32.mxu1 %vm1755_vm0, %v1756_v1  ;;  %v675_v1 = vld [vmem:[%s2683_s7 + $0x180] sm:$0xff]  ;;  %v742_v44 = vshrl.u32 %v741_v43, 7 }
 0x2d5   :  { %v1709_v8 = vpack.c.bf16 %v682_v4, %v675_v1 }
 0x2d6   :  { %1674 = vmatpush1.bf16.msra.mxu0 %v1673_v53  ;;  %1704 = vmatpush3.bf16.msra.mxu1 %v1703_v54  ;;  %v743_v46 = vsub.s32 0, %v742_v44  ;;  %v751_v47 = vsub.s32 2, %v742_v44  ;;  %v747_v49 = vsub.s32 1, %v742_v44  ;;  %v755_v50 = vsub.s32 3, %v742_v44 }
 0x2d7   :  { %1676 = vmatprep.subr.bf16.mxu0 %v1675_v56  ;;  %1705 = vmatprep.subr.bf16.mxu1 %v1754_v51  ;;  %v767_v11 = vsub.s32 6, %v742_v44  ;;  %v763_v12 = vsub.s32 5, %v742_v44 }
 0x2d8   :  { %v744_v52 = vrot.slane %v739_v48, %v743_v46  ;;  %v752_v53 = vrot.slane %v739_v48, %v751_v47  ;;  %v748_v54 = vrot.slane %v739_v48, %v747_v49 }
 0x2d9   :  { %v764_v18 = vrot.slane %v739_v48, %v763_v12 }
 0x2da   :  { %1678 = vmatpush1.bf16.msra.mxu0 %v1677_v62  ;;  %1707 = vmatpush3.bf16.msra.mxu1 %v1706_v63 }
 0x2db   :  { %1680 = vmatprep.subr.bf16.mxu0 %v1679_v2  ;;  %1708 = vmatprep.subr.bf16.mxu1 %v1754_v51 }
 0x2de   :  { %1682 = vmatpush1.bf16.msra.mxu0 %v1681_v7  ;;  %1710 = vmatpush3.bf16.msra.mxu1 %v1709_v8 }
 0x2df   :  { %1684 = vmatprep.subr.bf16.mxu0 %v1683_v10  ;;  %1711 = vmatprep.subr.bf16.mxu1 %v1754_v51  ;;  %v759_v10 = vsub.s32 4, %v742_v44 }
 0x2e1   :  { %v760_v15 = vrot.slane %v739_v48, %v759_v10 }
 0x2e2   :  { %1686 = vmatpush1.bf16.msra.mxu0 %v1685_v16  ;;  %1713 = vmatpush3.bf16.msra.mxu1 %v1712_v17  ;;  %v768_v16 = vrot.slane %v739_v48, %v767_v11 }
 0x2e3   :  { %1688 = vmatprep.subr.bf16.mxu0 %v1687_v19  ;;  %1714 = vmatprep.subr.bf16.mxu1 %v1754_v51 }
 0x2e6   :  { %1690 = vmatpush1.bf16.msra.mxu0 %v1689_v25  ;;  %1716 = vmatpush3.bf16.msra.mxu1 %v1715_v26 }
 0x2e7   :  { %1692 = vmatprep.subr.bf16.mxu0 %v1691_v28  ;;  %1717 = vmatprep.subr.bf16.mxu1 %v1754_v51 }
 0x2ea   :  { %1694 = vmatpush1.bf16.msra.mxu0 %v1693_v34  ;;  %1719 = vmatpush3.bf16.msra.mxu1 %v1718_v35 }
 0x2eb   :  { %1696 = vmatprep.subr.bf16.mxu0 %v1695_v37  ;;  %1720 = vmatprep.subr.bf16.mxu1 %v1754_v51  ;;  %v756_v51 = vrot.slane %v739_v48, %v755_v50 }
 0x2ee   :  { %1698 = vmatpush1.bf16.msra.mxu0 %v1697_v41  ;;  %1722 = vmatpush3.bf16.msra.mxu1 %v1721_v42 }
 0x2f1   :  { %983 = vmatmul.mubr.f32.vlgmr.msra.gmra.mrb[8].mxu0 %v2521_v45  ;;  %1433 = vmatmul.mubr.f32.vlgmr.msra.gmra.mrb[8].mxu1 %v2521_v45 }
 0x3a4   :  { %v842_v55 = vpop.f32.mrb[6].mxu0  ;;  %v913_v56 = vpop.f32.mrb[6].mxu1 }
 0x3a5   :  { %v843_v57 = vadd.f32 %v842_v55, %v744_v52  ;;  %v914_v58 = vadd.f32 %v913_v56, %v752_v53  ;;  %v844_v59 = vpop.f32.mrb[7].mxu0  ;;  %v915_v45 = vpop.f32.mrb[7].mxu1 }
 0x3a6   :  { %v845_v60 = vadd.f32 %v844_v59, %v748_v54  ;;  %v916_v61 = vadd.f32 %v915_v45, %v756_v51 }
 0x3a7   :  { %v1115_v62 = vmul.f32 -1.442695, %v843_v57  ;;  %v1117_v63 = vmul.f32 -1.442695, %v914_v58 }
 0x3a8   :  { %v1116_v0 = vmul.f32 -1.442695, %v845_v60  ;;  %v1118_v2 = vmul.f32 -1.442695, %v916_v61 }
 0x3a9   :  { %1726 = vpow2.f32 %v1115_v62 }
 0x3aa   :  { %1728 = vpow2.f32 %v1117_v63 }
 0x3ab   :  { %1730 = vpow2.f32 %v1116_v0 }
 0x3ac   :  { %1732 = vpow2.f32 %v1118_v2 }
 0x3b3   :  { %v1727_v3 = vpop.eup %1726 }
 0x3b4   :  { %v1729_v1 = vpop.eup %1728  ;;  %v1080_v4 = vadd.f32 1.0, %v1727_v3 }
 0x3b5   :  { %v1731_v5 = vpop.eup %1730  ;;  %v1082_v6 = vadd.f32 1.0, %v1729_v1 }
 0x3b6   :  { %v1733_v7 = vpop.eup %1732  ;;  %1734 = vrcp.f32 %v1080_v4  ;;  %v1081_v8 = vadd.f32 1.0, %v1731_v5 }
 0x3b7   :  { %1736 = vrcp.f32 %v1082_v6  ;;  %v1083_v9 = vadd.f32 1.0, %v1733_v7 }
 0x3b8   :  { %1738 = vrcp.f32 %v1081_v8 }
 0x3b9   :  { %1740 = vrcp.f32 %v1083_v9 }
 0x3c0   :  { %v1735_v13 = vpop.eup %1734 }
 0x3c1   :  { %v1737_v14 = vpop.eup %1736  ;;  %1101 = vst [vmem:[%s2687_s9] sm:$0xff] %v1735_v13 }
 0x3c2   :  { %v1739_v17 = vpop.eup %1738  ;;  %1103 = vst [vmem:[%s2687_s9 + $0x10] sm:$0xff] %v1737_v14 }
 0x3c3   :  { %v1741_v19 = vpop.eup %1740  ;;  %1102 = vst [vmem:[%s2687_s9 + $0x8] sm:$0xff] %v1739_v17 }
 0x3c4   :  { %1104 = vst [vmem:[%s2687_s9 + $0x18] sm:$0xff] %v1741_v19  ;;  %v984_v20 = vpop.f32.mrb[8].mxu0  ;;  %v1055_v21 = vpop.f32.mrb[8].mxu1 }
 0x3c5   :  { %v985_v22 = vadd.f32 %v984_v20, %v760_v15  ;;  %v1056_v23 = vadd.f32 %v1055_v21, %v768_v16  ;;  %v986_v24 = vpop.f32.mrb[9].mxu0  ;;  %v1434_v25 = vpop.f32.mrb[9].mxu1 }
 0x3c6   :  { %v987_v26 = vadd.f32 %v986_v24, %v764_v18 }
 0x3c7   :  { %v1119_v27 = vmul.f32 -1.442695, %v985_v22  ;;  %v1121_v28 = vmul.f32 -1.442695, %v1056_v23 }
 0x3c8   :  { %v1120_v29 = vmul.f32 -1.442695, %v987_v26 }
 0x3c9   :  { %1742 = vpow2.f32 %v1119_v27 }
 0x3ca   :  { %1744 = vpow2.f32 %v1121_v28 }
 0x3cb   :  { %1746 = vpow2.f32 %v1120_v29 }
 0x3d3   :  { %v1743_v30 = vpop.eup %1742 }
 0x3d4   :  { %v1745_v31 = vpop.eup %1744  ;;  %v1084_v32 = vadd.f32 1.0, %v1743_v30 }
 0x3d5   :  { %v1747_v33 = vpop.eup %1746  ;;  %v1086_v34 = vadd.f32 1.0, %v1745_v31 }
 0x3d6   :  { %1748 = vrcp.f32 %v1084_v32  ;;  %v1085_v35 = vadd.f32 1.0, %v1747_v33 }
 0x3d7   :  { %1750 = vrcp.f32 %v1086_v34 }
 0x3d8   :  { %1752 = vrcp.f32 %v1085_v35 }
 0x3e0   :  { %v1749_v36 = vpop.eup %1748 }
 0x3e1   :  { %v1751_v37 = vpop.eup %1750  ;;  %1105 = vst [vmem:[%s2687_s9 + $0x20] sm:$0xff] %v1749_v36 }
 0x3e2   :  { %v1753_v38 = vpop.eup %1752  ;;  %1107 = vst [vmem:[%s2687_s9 + $0x30] sm:$0xff] %v1751_v37 }
 0x3e3   :  { %1106 = vst [vmem:[%s2687_s9 + $0x28] sm:$0xff] %v1753_v38 }

</bundles_post_ra>
